<compile_context>
chip_gen: v6e
topology: v6e:2x2x1
jax: 0.10.0
libtpu: 0.0.40
codegen_flags: <defaults>
</compile_context>

<pallas_src>
import functools

import jax
import jax.numpy as jnp
from jax.experimental import pallas as pl
from jax.experimental.pallas import tpu as pltpu


def _round_up(x, m):
    return (x + m - 1) // m * m


def _footprint_bytes(tm, K, tn, in_bytes, out_bytes, weight_bufs):
    # Per-step VMEM footprint: double-buffered patches + output, weight/bias
    # with `weight_bufs` buffers (1 when their block never changes).
    return (tm * K * in_bytes * 2
            + K * tn * in_bytes * weight_bufs
            + tn * 4 * weight_bufs
            + tm * tn * out_bytes * 2)


def _select_tiles(M, K, E, in_bytes, out_bytes, budget):
    """Pick (tm, tn, Ep).  Prefer tn == E (single E strip: weight resident,
    patches streamed once) and tm a divisor of M (no row padding / no slice)."""
    if M <= 256:
        tm_cands = [_round_up(M, 16)]              # single row block
    else:
        tm_cands = ([c for c in (1024, 512, 256, 128) if M % c == 0]
                    or [512, 256, 128])            # last resort: pad M
    # Preferred: whole embed dim in one strip.
    for tm in tm_cands:
        if _footprint_bytes(tm, K, E, in_bytes, out_bytes, weight_bufs=1) <= budget:
            return tm, E, E
    # Fallback (very large K*E): tile E in 128-multiples (pad E if necessary).
    Ep = _round_up(E, 128)
    tn_cands = [c for c in (1024, 768, 512, 384, 256, 128) if Ep % c == 0] or [128]
    for tn in tn_cands:
        for tm in tm_cands:
            if _footprint_bytes(tm, K, tn, in_bytes, out_bytes, weight_bufs=2) <= budget:
                return tm, tn, Ep
    return tm_cands[-1], tn_cands[-1], Ep


def _spec(block_shape, index_map, *, single_buffer=False):
    # Single-buffer blocks whose index never changes (weight / bias once the E
    # axis collapses and the grid revisits them): the second pipeline buffer is
    # pure VMEM waste.  Falls back cleanly if pipeline_mode is unavailable.
    if single_buffer and hasattr(pl, "Buffered"):
        try:
            return pl.BlockSpec(block_shape, index_map, pipeline_mode=pl.Buffered(1))
        except TypeError:   # older BlockSpec without pipeline_mode kwarg
            pass
    return pl.BlockSpec(block_shape, index_map)


def _patch_embed_kernel(x_ref, w_ref, b_ref, o_ref):
    # x_ref: (tm, K) patches, w_ref: (K, tn) weight^T, b_ref: (1, tn) f32 bias.
    acc = jnp.dot(x_ref[...], w_ref[...], preferred_element_type=jnp.float32)
    o_ref[...] = (acc + b_ref[...]).astype(o_ref.dtype)


def patch_embed(x, weight, bias, patch_size, *,
                compute_dtype=jnp.bfloat16, out_dtype=None):
    """
    x      : (B, C, H, W)  NCHW, same as the PyTorch module
    weight : (E, C, P, P)  Conv2d weight
    bias   : (E,)          Conv2d bias
    returns: (B, num_patches, E) in `out_dtype` (default: x.dtype)

    compute_dtype=jnp.float32 is the escape hatch for tighter parity with a
    pure-f32 conv; bf16 MXU inputs with f32 accumulation is the fast default.
    """
    B, C, H, W = x.shape
    E = weight.shape[0]
    P = patch_size
    Hp, Wp = H // P, W // P
    Np = Hp * Wp
    K = C * P * P
    M = B * Np
    out_dtype = x.dtype if out_dtype is None else out_dtype

    in_bytes = jnp.dtype(compute_dtype).itemsize
    out_bytes = jnp.dtype(out_dtype).itemsize

    # --- glue: cast FIRST (half the bytes through the strided transpose), then
    # extract non-overlapping patches with inner order (c, ph, pw) — identical
    # to flattening the Conv2d weight (E, C, P, P).
    # TODO(synk): fuse the patchify into the kernel (grid over (b, hp), pull
    # (C, P, W) slabs of x via the BlockSpec and do the flatten in VMEM) to
    # remove this HBM round trip entirely at ViT scale.
    xc = x.astype(compute_dtype)
    patches = xc.reshape(B, C, Hp, P, Wp, P).transpose(0, 2, 4, 1, 3, 5)
    patches = patches.reshape(M, K)                                   # (M, K)
    w_mat = weight.astype(compute_dtype).reshape(E, K).T              # (K, E)
    b_mat = bias.astype(jnp.float32).reshape(1, E)                    # (1, E)

    # --- tile selection: fit the 32 MiB scoped-VMEM budget (safe on v5e/v6e/
    # v7x).  On v6e there is headroom to raise vmem_limit_bytes (~64 MiB) and
    # bump tm if profiling shows exposed DMA.
    vmem_limit = 32 * 1024 * 1024
    tm, tn, Ep = _select_tiles(M, K, E, in_bytes, out_bytes,
                               budget=int(vmem_limit * 0.85))
    Mp = _round_up(M, tm)

    if Mp != M:
        patches = jnp.pad(patches, ((0, Mp - M), (0, 0)))
    if Ep != E:
        w_mat = jnp.pad(w_mat, ((0, 0), (0, Ep - E)))
        b_mat = jnp.pad(b_mat, ((0, 0), (0, Ep - E)))

    n_e, n_m = Ep // tn, Mp // tm
    grid = (n_e, n_m)                 # E outer -> weight strip resident over M sweep
    const_wb = (n_e == 1 and n_m > 1)  # weight/bias block never changes -> 1 buffer

    cost = pl.CostEstimate(
        flops=2 * Mp * K * Ep,
        transcendentals=0,
        bytes_accessed=(n_e * Mp * K * in_bytes    # patches, re-read per E strip
                        + K * Ep * in_bytes        # weight, read once per strip
                        + Ep * 4                   # bias
                        + Mp * Ep * out_bytes),    # (padded) output write
    )

    # TODO(synk): for very large K (e.g. P=32 video patches, K >= 3072) add a
    # K grid axis marked "arbitrary" with an f32 VMEM accumulator + pl.when
    # init/finalize so the per-step footprint stays bounded on v7x.
    out = pl.pallas_call(
        _patch_embed_kernel,
        out_shape=jax.ShapeDtypeStruct((Mp, Ep), out_dtype),
        grid=grid,
        in_specs=[
            pl.BlockSpec((tm, K), lambda e, m: (m, 0)),                   # streamed patches
            _spec((K, tn), lambda e, m: (0, e), single_buffer=const_wb),  # resident weight
            _spec((1, tn), lambda e, m: (0, e), single_buffer=const_wb),  # bias strip
        ],
        out_specs=pl.BlockSpec((tm, tn), lambda e, m: (m, e)),
        compiler_params=pltpu.CompilerParams(
            dimension_semantics=("parallel", "parallel"),
            vmem_limit_bytes=vmem_limit,
        ),
        cost_estimate=cost,
    )(patches, w_mat, b_mat)

    if Mp != M or Ep != E:
        out = out[:M, :E]
    return out.reshape(B, Np, E)


if __name__ == "__main__":
    # Small shapes consistent with the module: img_size=16, patch_size=4,
    # in_chans=4, embed_dim=32  -> num_patches = 16, patch_dim K = 64.
    B, C, H, W = 2, 4, 16, 16
    P = 4
    E = 32

    key = jax.random.PRNGKey(0)
    kx, kw, kb = jax.random.split(key, 3)
    x = jax.random.normal(kx, (B, C, H, W), dtype=jnp.float32)
    weight = jax.random.normal(kw, (E, C, P, P), dtype=jnp.float32) * 0.02
    bias = jax.random.normal(kb, (E,), dtype=jnp.float32) * 0.02

    pe = jax.jit(functools.partial(patch_embed, patch_size=P))
    pe_bf16 = jax.jit(functools.partial(patch_embed, patch_size=P,
                                        out_dtype=jnp.bfloat16))

    out = jax.block_until_ready(pe(x, weight, bias))
    out_bf16 = jax.block_until_ready(pe_bf16(x, weight, bias))

    # Reference: lax conv (same semantics as nn.Conv2d stride=kernel) in f32.
    ref = jax.lax.conv_general_dilated(
        x, weight, window_strides=(P, P), padding="VALID",
        dimension_numbers=("NCHW", "OIHW", "NCHW"),
    ) + bias.reshape(1, E, 1, 1)
    ref = ref.reshape(B, E, -1).transpose(0, 2, 1)  # flatten(2).transpose(1,2)

    assert out.shape == (B, (H // P) * (W // P), E), out.shape
    assert out.dtype == x.dtype, out.dtype
    assert out_bf16.dtype == jnp.bfloat16, out_bf16.dtype
    # bf16 MXU inputs with f32 accumulation: loose-but-tight-enough tolerance.
    assert jnp.allclose(out, ref, atol=2e-2, rtol=2e-2), "mismatch vs reference"
    assert jnp.allclose(out_bf16.astype(jnp.float32), ref, atol=3e-2, rtol=3e-2), \
        "bf16-output mismatch vs reference"

    print("KERNEL_OK")
</pallas_src>

<mosaic_0001>
module attributes {stable_mosaic.version = 11 : i64} {
  func.func @_patch_embed_kernel(%arg0: i32, %arg1: i32, %arg2: memref<32x64xbf16, #tpu.memory_space<vmem>>, %arg3: memref<64x32xbf16, #tpu.memory_space<vmem>>, %arg4: memref<1x32xf32, #tpu.memory_space<vmem>>, %arg5: memref<32x32xf32, #tpu.memory_space<vmem>>) attributes {dimension_semantics = [#tpu.dimension_semantics<parallel>, #tpu.dimension_semantics<parallel>], iteration_bounds = array<i64: 1, 1>, scalar_prefetch = 0 : i64, scratch_operands = 0 : i64, tpu.core_type = #tpu.core_type<tc>, window_params = [{transform_indices = @transform_0, window_bounds = array<i64: 32, 64>}, {transform_indices = @transform_1, window_bounds = array<i64: 64, 32>}, {transform_indices = @transform_2, window_bounds = array<i64: 1, 32>}, {transform_indices = @transform_3, window_bounds = array<i64: 32, 32>}]} {
    %c0 = arith.constant 0 : index
    %c0_0 = arith.constant 0 : index
    %0 = vector.load %arg2[%c0, %c0_0] : memref<32x64xbf16, #tpu.memory_space<vmem>>, vector<32x64xbf16>
    %c0_1 = arith.constant 0 : index
    %c0_2 = arith.constant 0 : index
    %1 = vector.load %arg3[%c0_1, %c0_2] : memref<64x32xbf16, #tpu.memory_space<vmem>>, vector<64x32xbf16>
    %cst = arith.constant dense<0.000000e+00> : vector<32x32xf32>
    %2 = tpu.matmul %0, %1, %cst {dimension_numbers = #tpu.dot_dimension_numbers<[1], [0], [0], [1], [0, 0, 1, 1], [], []>} : vector<32x64xbf16>, vector<64x32xbf16>, vector<32x32xf32> -> vector<32x32xf32>
    %c0_3 = arith.constant 0 : index
    %c0_4 = arith.constant 0 : index
    %3 = vector.load %arg4[%c0_3, %c0_4] : memref<1x32xf32, #tpu.memory_space<vmem>>, vector<1x32xf32>
    %4 = vector.broadcast %3 : vector<1x32xf32> to vector<32x32xf32>
    %5 = arith.addf %2, %4 : vector<32x32xf32>
    %c0_5 = arith.constant 0 : index
    %c0_6 = arith.constant 0 : index
    %6 = vector.load %arg5[%c0_5, %c0_6] : memref<32x32xf32, #tpu.memory_space<vmem>>, vector<32x32xf32>
    tpu.vector_store %arg5[%c0_5, %c0_6], %5 {strides = array<i32>} : memref<32x32xf32, #tpu.memory_space<vmem>>, vector<32x32xf32>,
    return
  }
  func.func @transform_0(%arg0: i32, %arg1: i32) -> (i32, i32) {
    %c0_i32 = arith.constant 0 : i32
    %c0_i32_0 = arith.constant 0 : i32
    return %arg1, %c0_i32 : i32, i32
  }
  func.func @transform_1(%arg0: i32, %arg1: i32) -> (i32, i32) {
    %c0_i32 = arith.constant 0 : i32
    %c0_i32_0 = arith.constant 0 : i32
    return %c0_i32, %arg0 : i32, i32
  }
  func.func @transform_2(%arg0: i32, %arg1: i32) -> (i32, i32) {
    %c0_i32 = arith.constant 0 : i32
    %c0_i32_0 = arith.constant 0 : i32
    return %c0_i32, %arg0 : i32, i32
  }
  func.func @transform_3(%arg0: i32, %arg1: i32) -> (i32, i32) {
    %c0_i32 = arith.constant 0 : i32
    return %arg1, %arg0 : i32, i32
  }
}

</mosaic_0001>

<bundles_post_ra>
// kernel: patch_embed.1
= control target key start
LH: loop header
LB: loop body
LE: loop exit
PB: predicated region body
PF: predicated region fallthrough
CT: control target
= control target key end

     0   :  { %vm69_vm0 = vcmask 523264   ;;  %s251_s0 = inlined_call_operand.vmem [shape: bf16[32,64], index: 0, kind: input, shape index: {}]   ;;  %s252_s1 = inlined_call_operand.vmem [shape: bf16[64,32], index: 1, kind: input, shape index: {}]   ;;  %s253_s2 = inlined_call_operand.vmem [shape: f32[1,32], index: 2, kind: input, shape index: {}]   ;;  %s254_s3 = inlined_call_operand.hbm [shape: f32[32,32], index: 3, kind: output, shape index: {}]  }
   0x1   :  { %v176_v0 = vld [vmem:[%s252_s1 + $0x18] sm:$0xff]   ;;  %v177_v1 = vld [vmem:[%s252_s1 + $0x10] sm:$0xff]   ;;  %v178_v2 = vld [vmem:[%s252_s1 + $0x8] sm:$0xff]  }
   0x2   :  { %161 = vmatprep.subr.bf16.mxu0 %v176_v0  ;;  %v180_v3 = vld [vmem:[%s251_s0] sm:$0xff]  }
   0x3   :  { %162 = vmatpush3.bf16.msra.mxu0 %v176_v0  ;;  %169 = vmatprep.mubr.msk.bf16.mxu0 %vm69_vm0, %v180_v3 }
   0x4   :  { %163 = vmatprep.subr.bf16.mxu0 %v177_v1 }
   0x5   :  { %8 = vsyncpa [#allocation3], 0  ;;  %v179_v4 = vld [vmem:[%s252_s1] sm:$0xff]   ;;  %v181_v5 = vld [vmem:[%s251_s0 + $0x8] sm:$0xff]   ;;  %vm125_vm1 = vcmask 261120   ;;  %s204_s26 = smov [#allocation2]  }
   0x6   :  { %v146_v6 = vld [vmem:[%s253_s2] ss:$0 sm:$0xff]  ;;  %s135_s1 = sshll.u32 %s204_s26, 4  ;;  %s136_s1 = int_to_ptr.vmem [resolvable:$true] %s135_s1 }
   0x7   :  { %164 = vmatpush3.bf16.msra.mxu0 %v177_v1  ;;  %s182_s0 = scalar_lea.vmem %s136_s1, 512  ;;  %p187_p1 = scmp.lt.s32.totalorder %s136_s1, %s136_s1 }
   0x8   :  { %165 = vmatprep.subr.bf16.mxu0 %v178_v2  ;;  %p183_p0 = scmp.ne.s32.totalorder %s136_s1, %s182_s0  ;;  %p188_p2 = scmp.lt.s32.totalorder %s182_s0, %s182_s0 }
   0xa   :  { %p189_p3 = por %p188_p2, %p187_p1 }
   0xb   :  { %166 = vmatpush3.bf16.msra.mxu0 %v178_v2 }
   0xc   :  { %167 = vmatprep.subr.bf16.mxu0 %v179_v4  ;;  %p190_p4 = pnand %p189_p3, %p183_p0 }
   0xf   :  { %168 = vmatpush3.bf16.msra.mxu0 %v179_v4 }
  0x12   :  { %170 = vmatmul.mubr.msk.bf16.vlgmr.msra.gmra.mxu0 %vm69_vm0, %v181_v5 }
  0xd2   :  { %v171_v7 = vpop.f32.mrf.mxu0 }
  0xd3   :  { %v119_v8 = vadd.f32 %v171_v7, %v146_v6 }
  0xd4   :  { %v110_v9 = vpop.f32.mrf.mxu0 }
  0xd5   :  { %128 = vst.msk [vmem:[#allocation2 + $0x10] sm:$0xff] %vm125_vm1, %v119_v8  ;;  %v111_v10 = vadd.f32 %v146_v6, %v110_v9 }
  0xd6   :  { %v172_v11 = vpop.f32.mrf.mxu0 }
  0xd7   :  { %126 = vst.msk [vmem:[#allocation2] sm:$0xff] %vm125_vm1, %v111_v10  ;;  %v122_v12 = vadd.f32 %v172_v11, %v146_v6 }
  0xd8   :  { %v113_v13 = vpop.f32.mrf.mxu0 }
  0xd9   :  { %129 = vst.msk [vmem:[#allocation2 + $0x18] sm:$0xff] %vm125_vm1, %v122_v12  ;;  %v114_v14 = vadd.f32 %v146_v6, %v113_v13 }
  0xdb   :  { %127 = vst.msk [vmem:[#allocation2 + $0x8] sm:$0xff] %vm125_vm1, %v114_v14 }
  0xdc   :  { %193 = shalt.err (!%p190_p4)
}
  0xdd   :  { %s205_s2 = smov 128   ;;  %s206_s27 = smov 8  }
  0xde   :  { %141 = dma.vmem_to_hbm [thread:$0]  %s136_s1, 512, %s254_s3, [#allocation3], %s205_s2, %s205_s2, %s206_s27  }
  0xdf   :  { %202 = dma.done.wait [#allocation3], 512  }
  0xe0   :  { %203 = vsyncadd [#allocation3], 4294966784 }
  0xe1   :  { %145 = vsyncpa [#allocation3], 1 }

</bundles_post_ra>
